<compile_context>
chip_gen: v5e
topology: v5e:2x2
jax: 0.10.0
libtpu: 0.0.40
codegen_flags: <defaults>
</compile_context>

<pallas_src>
import jax
import jax.numpy as jnp
from jax.experimental import pallas as pl
from jax.experimental.pallas import tpu as pltpu


# -----------------------------------------------------------------------------
# Pallas kernel
# -----------------------------------------------------------------------------
def _gru_kernel(x_ref, wih_ref, bih_ref, whh_ref, bhhn_ref, wfc_ref, bfc_ref,
                out_ref, hn_ref):
    """
    x_ref:    (seq*bp, E)  bf16   time-major, batch padded to bp (multiple of 8)
    wih_ref:  (E, 6G)      bf16   cols gate-major [r_f r_b | z_f z_b | n_f n_b]
    bih_ref:  (1, 6G)      f32    b_ih (all gates) + b_hh (r,z gates only)
    whh_ref:  (2G, 6G)     bf16   block-diag (rows [h_f | h_b]), same col layout
    bhhn_ref: (1, 2G)      f32    b_hh of the n gate, [n_f | n_b]
    wfc_ref:  (2G, H)      bf16   rows [fwd | bwd]
    bfc_ref:  (1, H)       f32
    out_ref:  (seq*bp, H)  f32
    hn_ref:   (2*bp, G)    f32    rows [0:bp]=h_fwd, [bp:2bp]=h_bwd
    """
    bp = hn_ref.shape[0] // 2
    g = hn_ref.shape[1]
    g2 = 2 * g
    seq = x_ref.shape[0] // bp

    # Hoisted input projection: both directions, all timesteps, one MXU op.
    gi = jnp.dot(x_ref[...], wih_ref[...],
                 preferred_element_type=jnp.float32) + bih_ref[...]   # (seq*bp, 6G)

    # Loop-invariant operands: read / broadcast once, outside the unrolled loop.
    whh = whh_ref[...]                                                # (2G, 6G) bf16
    bhhn = jnp.broadcast_to(bhhn_ref[...], (bp, g2))                  # (bp, 2G)  f32
    col6 = jax.lax.broadcasted_iota(jnp.int32, (bp, 3 * g2), 1)
    fwd6 = (col6 % g2) < g            # forward-direction columns of the 6G layout
    col2 = jax.lax.broadcasted_iota(jnp.int32, (bp, g2), 1)
    fwd2 = col2 < g                   # forward half of a [fwd | bwd] 2G slab

    # Fully unrolled recurrence; hidden state [h_f | h_b] lives in vregs.
    h = jnp.zeros((bp, g2), jnp.float32)
    hs = []
    for s in range(seq):
        sb = seq - 1 - s
        # fwd gates use x(t=s), bwd gates use x(t=seq-1-s): one lane select,
        # independent of h so it sits off the serial dependency chain.
        gi_s = jnp.where(fwd6,
                         gi[s * bp:(s + 1) * bp, :],
                         gi[sb * bp:(sb + 1) * bp, :])                # (bp, 6G)
        gh = jnp.dot(h.astype(jnp.bfloat16), whh,
                     preferred_element_type=jnp.float32)              # (bp, 6G)
        rz = jax.nn.sigmoid(gi_s[:, :2 * g2] + gh[:, :2 * g2])        # (bp, 4G)
        r = rz[:, :g2]
        z = rz[:, g2:]
        n = jnp.tanh(gi_s[:, 2 * g2:] + r * (gh[:, 2 * g2:] + bhhn))
        h = (1.0 - z) * n + z * h
        hs.append(h)

    # Final hidden states (fwd = after time seq-1, bwd = after time 0).
    hn_ref[pl.ds(0, bp), :] = h[:, :g]
    hn_ref[pl.ds(bp, bp), :] = h[:, g:]

    # Assemble per-time [out_fwd(t) | out_bwd(t)] in registers (time order):
    # bwd hidden at time t was produced at recurrence step seq-1-t.
    ofb = jnp.concatenate(
        [jnp.where(fwd2, hs[t], hs[seq - 1 - t]) for t in range(seq)], axis=0)

    # fc(concat(out_f, out_b)) + ReLU as ONE slab matmul, one dense store.
    y = jnp.dot(ofb.astype(jnp.bfloat16), wfc_ref[...],
                preferred_element_type=jnp.float32) + bfc_ref[...]
    out_ref[...] = jnp.maximum(y, 0.0)


# -----------------------------------------------------------------------------
# Wrapper
# -----------------------------------------------------------------------------
@jax.jit
def gru_forward(X, params):
    """X: (batch, seq, emb). Returns (out (seq,batch,H), h_n (2,batch,G))."""
    wih, bih, whh, bhhn, wfc, bfc = params
    batch, seq, emb = X.shape
    G = whh.shape[0] // 2
    H = wfc.shape[1]
    BP = ((batch + 7) // 8) * 8          # pad batch to sublane granularity

    # Time-major + pad batch rows + cast; fuses into one small copy in XLA.
    x_tm = jnp.transpose(X, (1, 0, 2))                         # (seq, batch, E)
    x_p = jnp.pad(x_tm, ((0, 0), (0, BP - batch), (0, 0)))     # (seq, BP, E)
    x_flat = x_p.reshape(seq * BP, emb).astype(jnp.bfloat16)

    vmem = pl.BlockSpec(memory_space=pltpu.MemorySpace.VMEM)

    out2d, hn2d = pl.pallas_call(
        _gru_kernel,
        out_shape=(jax.ShapeDtypeStruct((seq * BP, H), jnp.float32),
                   jax.ShapeDtypeStruct((2 * BP, G), jnp.float32)),
        in_specs=[vmem] * 7,
        out_specs=(vmem, vmem),
    )(x_flat, wih, bih, whh, bhhn, wfc, bfc)

    out = out2d.reshape(seq, BP, H)[:, :batch, :]
    h_n = hn2d.reshape(2, BP, G)[:, :batch, :]
    return out, h_n


# -----------------------------------------------------------------------------
# Parameters: PyTorch-native layouts + packing into the fused kernel layouts
# -----------------------------------------------------------------------------
def init_params(key, emb_dim, gru_dim, hidden_dim):
    """PyTorch-native parameter layouts (gate order [r, z, n])."""
    kgru = 1.0 / jnp.sqrt(gru_dim)
    kfc = 1.0 / jnp.sqrt(2 * gru_dim)
    keys = jax.random.split(key, 10)

    def u(k, shape, scale):
        return jax.random.uniform(k, shape, jnp.float32, -scale, scale)

    return dict(
        w_ih_f=u(keys[0], (3 * gru_dim, emb_dim), kgru),
        w_hh_f=u(keys[1], (3 * gru_dim, gru_dim), kgru),
        b_ih_f=u(keys[2], (3 * gru_dim,), kgru),
        b_hh_f=u(keys[3], (3 * gru_dim,), kgru),
        w_ih_b=u(keys[4], (3 * gru_dim, emb_dim), kgru),
        w_hh_b=u(keys[5], (3 * gru_dim, gru_dim), kgru),
        b_ih_b=u(keys[6], (3 * gru_dim,), kgru),
        b_hh_b=u(keys[7], (3 * gru_dim,), kgru),
        w_fc=u(keys[8], (hidden_dim, 2 * gru_dim), kfc),
        b_fc=u(keys[9], (hidden_dim,), kfc),
    )


def make_kernel_params(tp, emb_dim, gru_dim, hidden_dim):
    """Pack PyTorch-layout params into the fused layouts the kernel expects."""
    E, G, H = emb_dim, gru_dim, hidden_dim

    def w_gate(w, g):            # torch (3G, in) -> (in, G) for gate g
        return w[g * G:(g + 1) * G, :].T

    def b_gate(b, g):
        return b[g * G:(g + 1) * G]

    # Columns gate-major: [r_f r_b | z_f z_b | n_f n_b].
    wih = jnp.zeros((E, 6 * G), jnp.float32)
    whh = jnp.zeros((2 * G, 6 * G), jnp.float32)
    for g in range(3):
        c0 = 2 * g * G
        wih = wih.at[:, c0:c0 + G].set(w_gate(tp['w_ih_f'], g))
        wih = wih.at[:, c0 + G:c0 + 2 * G].set(w_gate(tp['w_ih_b'], g))
        whh = whh.at[:G, c0:c0 + G].set(w_gate(tp['w_hh_f'], g))
        whh = whh.at[G:, c0 + G:c0 + 2 * G].set(w_gate(tp['w_hh_b'], g))

    # b_ih for all gates, plus b_hh for r/z merged in (added once, outside loop).
    bih_cols = []
    for g in range(3):
        add_hh = 1.0 if g < 2 else 0.0
        bih_cols.append(b_gate(tp['b_ih_f'], g) + add_hh * b_gate(tp['b_hh_f'], g))
        bih_cols.append(b_gate(tp['b_ih_b'], g) + add_hh * b_gate(tp['b_hh_b'], g))
    bih_cat = jnp.concatenate(bih_cols).reshape(1, 6 * G)
    bhh_n = jnp.concatenate([b_gate(tp['b_hh_f'], 2),
                             b_gate(tp['b_hh_b'], 2)]).reshape(1, 2 * G)

    return (wih.astype(jnp.bfloat16), bih_cat,
            whh.astype(jnp.bfloat16), bhh_n,
            tp['w_fc'].T.astype(jnp.bfloat16),        # (2G, H), rows [fwd | bwd]
            tp['b_fc'].reshape(1, H))


# -----------------------------------------------------------------------------
# Pure-JAX f32 reference (mirrors the PyTorch forward) for validation
# -----------------------------------------------------------------------------
def reference_forward(X, tp, gru_dim):
    x = jnp.transpose(X, (1, 0, 2)).astype(jnp.float32)   # (seq, batch, emb)
    G = gru_dim

    def run_dir(xs, w_ih, w_hh, b_ih, b_hh):
        def cell(h, x_t):
            gi = x_t @ w_ih.T + b_ih
            gh = h @ w_hh.T + b_hh
            r = jax.nn.sigmoid(gi[:, :G] + gh[:, :G])
            z = jax.nn.sigmoid(gi[:, G:2 * G] + gh[:, G:2 * G])
            n = jnp.tanh(gi[:, 2 * G:] + r * gh[:, 2 * G:])
            h_new = (1.0 - z) * n + z * h
            return h_new, h_new
        h0 = jnp.zeros((xs.shape[1], G), jnp.float32)
        h_last, ys = jax.lax.scan(cell, h0, xs)
        return ys, h_last

    out_f, hf = run_dir(x, tp['w_ih_f'], tp['w_hh_f'], tp['b_ih_f'], tp['b_hh_f'])
    out_b_rev, hb = run_dir(x[::-1], tp['w_ih_b'], tp['w_hh_b'], tp['b_ih_b'], tp['b_hh_b'])
    out_b = out_b_rev[::-1]
    gru_out = jnp.concatenate([out_f, out_b], axis=-1)
    y = jnp.maximum(gru_out @ tp['w_fc'].T + tp['b_fc'], 0.0)
    h_n = jnp.stack([hf, hb], axis=0)
    return y, h_n


if __name__ == "__main__":
    # conf_dict['net'] = {emb_dim: 16, gru_dim: 32, hidden_dim: 32, dropout: 0.1}
    batch, seq, emb_dim, gru_dim, hidden_dim = 2, 8, 16, 32, 32

    key = jax.random.PRNGKey(0)
    kx, kp = jax.random.split(key)
    X = jax.random.normal(kx, (batch, seq, emb_dim), jnp.float32)

    torch_params = init_params(kp, emb_dim, gru_dim, hidden_dim)
    kernel_params = make_kernel_params(torch_params, emb_dim, gru_dim, hidden_dim)

    out, h_n = gru_forward(X, kernel_params)
    jax.block_until_ready((out, h_n))

    assert out.shape == (seq, batch, hidden_dim)
    assert h_n.shape == (2, batch, gru_dim)

    ref_out, ref_hn = reference_forward(X, torch_params, gru_dim)
    # bf16 weights/activations on the MXU -> loosened tolerance vs f32 reference.
    assert jnp.allclose(out, ref_out, atol=3e-2, rtol=3e-2), "output mismatch"
    assert jnp.allclose(h_n, ref_hn, atol=3e-2, rtol=3e-2), "hidden state mismatch"

    print("KERNEL_OK")
</pallas_src>

<mosaic_0001>
module attributes {stable_mosaic.version = 11 : i64} {
  func.func @_gru_kernel(%arg0: memref<64x16xbf16, #tpu.memory_space<vmem>>, %arg1: memref<16x192xbf16, #tpu.memory_space<vmem>>, %arg2: memref<1x192xf32, #tpu.memory_space<vmem>>, %arg3: memref<64x192xbf16, #tpu.memory_space<vmem>>, %arg4: memref<1x64xf32, #tpu.memory_space<vmem>>, %arg5: memref<64x32xbf16, #tpu.memory_space<vmem>>, %arg6: memref<1x32xf32, #tpu.memory_space<vmem>>, %arg7: memref<64x32xf32, #tpu.memory_space<vmem>>, %arg8: memref<16x32xf32, #tpu.memory_space<vmem>>) attributes {dimension_semantics = [], scalar_prefetch = 0 : i64, scratch_operands = 0 : i64, tpu.core_type = #tpu.core_type<tc>} {
    %c0 = arith.constant 0 : index
    %c0_0 = arith.constant 0 : index
    %0 = vector.load %arg0[%c0, %c0_0] : memref<64x16xbf16, #tpu.memory_space<vmem>>, vector<64x16xbf16>
    %c0_1 = arith.constant 0 : index
    %c0_2 = arith.constant 0 : index
    %1 = vector.load %arg1[%c0_1, %c0_2] : memref<16x192xbf16, #tpu.memory_space<vmem>>, vector<16x192xbf16>
    %cst = arith.constant dense<0.000000e+00> : vector<64x192xf32>
    %2 = tpu.matmul %0, %1, %cst {dimension_numbers = #tpu.dot_dimension_numbers<[1], [0], [0], [1], [0, 0, 1, 1], [], []>} : vector<64x16xbf16>, vector<16x192xbf16>, vector<64x192xf32> -> vector<64x192xf32>
    %c0_3 = arith.constant 0 : index
    %c0_4 = arith.constant 0 : index
    %3 = vector.load %arg2[%c0_3, %c0_4] : memref<1x192xf32, #tpu.memory_space<vmem>>, vector<1x192xf32>
    %4 = vector.broadcast %3 : vector<1x192xf32> to vector<64x192xf32>
    %5 = arith.addf %2, %4 : vector<64x192xf32>
    %c0_5 = arith.constant 0 : index
    %c0_6 = arith.constant 0 : index
    %6 = vector.load %arg3[%c0_5, %c0_6] : memref<64x192xbf16, #tpu.memory_space<vmem>>, vector<64x192xbf16>
    %c0_7 = arith.constant 0 : index
    %c0_8 = arith.constant 0 : index
    %7 = vector.load %arg4[%c0_7, %c0_8] : memref<1x64xf32, #tpu.memory_space<vmem>>, vector<1x64xf32>
    %8 = vector.shape_cast %7 : vector<1x64xf32> to vector<1x64xf32>
    %9 = vector.broadcast %8 : vector<1x64xf32> to vector<8x64xf32>
    %10 = tpu.iota {dimensions = array<i32: 1>} : vector<8x192xi32>
    %c64_i32 = arith.constant 64 : i32
    %c0_i32 = arith.constant 0 : i32
    %11 = arith.cmpi eq, %c64_i32, %c0_i32 : i32
    %c1_i32 = arith.constant 1 : i32
    %12 = arith.select %11, %c1_i32, %c64_i32 : i32
    %13 = vector.broadcast %12 : i32 to vector<8x192xi32>
    %14 = arith.remsi %10, %13 : vector<8x192xi32>
    %c0_i32_9 = arith.constant 0 : i32
    %15 = vector.broadcast %c0_i32_9 : i32 to vector<8x192xi32>
    %16 = arith.cmpi ne, %14, %15 : vector<8x192xi32>
    %c0_i32_10 = arith.constant 0 : i32
    %17 = vector.broadcast %c0_i32_10 : i32 to vector<8x192xi32>
    %18 = arith.cmpi slt, %14, %17 : vector<8x192xi32>
    %c0_i32_11 = arith.constant 0 : i32
    %19 = arith.cmpi slt, %12, %c0_i32_11 : i32
    %20 = vector.broadcast %19 : i1 to vector<8x192xi1>
    %21 = vector.broadcast %20 : vector<8x192xi1> to vector<8x192xi1>
    %22 = arith.xori %18, %21 : vector<8x192xi1>
    %23 = arith.andi %22, %16 : vector<8x192xi1>
    %24 = vector.broadcast %12 : i32 to vector<8x192xi32>
    %25 = arith.addi %14, %24 : vector<8x192xi32>
    %26 = arith.select %23, %25, %14 : vector<8x192xi1>, vector<8x192xi32>
    %c32_i32 = arith.constant 32 : i32
    %27 = vector.broadcast %c32_i32 : i32 to vector<8x192xi32>
    %28 = arith.cmpi slt, %26, %27 : vector<8x192xi32>
    %29 = tpu.iota {dimensions = array<i32: 1>} : vector<8x64xi32>
    %c32_i32_12 = arith.constant 32 : i32
    %30 = vector.broadcast %c32_i32_12 : i32 to vector<8x64xi32>
    %31 = arith.cmpi slt, %29, %30 : vector<8x64xi32>
    %cst_13 = arith.constant 0.000000e+00 : f32
    %32 = vector.broadcast %cst_13 : f32 to vector<8x64xf32>
    %33 = vector.extract_strided_slice %5 {offsets = [0, 0], sizes = [8, 192], strides = [1, 1]} : vector<64x192xf32> to vector<8x192xf32>
    %34 = vector.extract_strided_slice %5 {offsets = [56, 0], sizes = [8, 192], strides = [1, 1]} : vector<64x192xf32> to vector<8x192xf32>
    %35 = arith.select %28, %33, %34 : vector<8x192xi1>, vector<8x192xf32>
    %36 = arith.truncf %32 : vector<8x64xf32> to vector<8x64xbf16>
    %cst_14 = arith.constant dense<0.000000e+00> : vector<8x192xf32>
    %37 = tpu.matmul %36, %6, %cst_14 {dimension_numbers = #tpu.dot_dimension_numbers<[1], [0], [0], [1], [0, 0, 1, 1], [], []>} : vector<8x64xbf16>, vector<64x192xbf16>, vector<8x192xf32> -> vector<8x192xf32>
    %38 = vector.extract_strided_slice %35 {offsets = [0, 0], sizes = [8, 128], strides = [1, 1]} : vector<8x192xf32> to vector<8x128xf32>
    %39 = vector.extract_strided_slice %37 {offsets = [0, 0], sizes = [8, 128], strides = [1, 1]} : vector<8x192xf32> to vector<8x128xf32>
    %40 = arith.addf %38, %39 : vector<8x128xf32>
    %41 = arith.negf %40 : vector<8x128xf32>
    %42 = math.exp %41 : vector<8x128xf32>
    %cst_15 = arith.constant 1.000000e+00 : f32
    %43 = vector.broadcast %cst_15 : f32 to vector<8x128xf32>
    %44 = arith.addf %43, %42 : vector<8x128xf32>
    %45 = arith.divf %43, %44 : vector<8x128xf32>
    %46 = vector.extract_strided_slice %45 {offsets = [0, 0], sizes = [8, 64], strides = [1, 1]} : vector<8x128xf32> to vector<8x64xf32>
    %47 = vector.extract_strided_slice %45 {offsets = [0, 64], sizes = [8, 64], strides = [1, 1]} : vector<8x128xf32> to vector<8x64xf32>
    %48 = vector.extract_strided_slice %35 {offsets = [0, 128], sizes = [8, 64], strides = [1, 1]} : vector<8x192xf32> to vector<8x64xf32>
    %49 = vector.extract_strided_slice %37 {offsets = [0, 128], sizes = [8, 64], strides = [1, 1]} : vector<8x192xf32> to vector<8x64xf32>
    %50 = arith.addf %49, %9 : vector<8x64xf32>
    %51 = arith.mulf %46, %50 : vector<8x64xf32>
    %52 = arith.addf %48, %51 : vector<8x64xf32>
    %53 = math.tanh %52 : vector<8x64xf32>
    %cst_16 = arith.constant 1.000000e+00 : f32
    %54 = vector.broadcast %cst_16 : f32 to vector<8x64xf32>
    %55 = arith.subf %54, %47 : vector<8x64xf32>
    %56 = arith.mulf %55, %53 : vector<8x64xf32>
    %57 = arith.mulf %47, %32 : vector<8x64xf32>
    %58 = arith.addf %56, %57 : vector<8x64xf32>
    %59 = vector.extract_strided_slice %5 {offsets = [8, 0], sizes = [8, 192], strides = [1, 1]} : vector<64x192xf32> to vector<8x192xf32>
    %60 = vector.extract_strided_slice %5 {offsets = [48, 0], sizes = [8, 192], strides = [1, 1]} : vector<64x192xf32> to vector<8x192xf32>
    %61 = arith.select %28, %59, %60 : vector<8x192xi1>, vector<8x192xf32>
    %62 = arith.truncf %58 : vector<8x64xf32> to vector<8x64xbf16>
    %cst_17 = arith.constant dense<0.000000e+00> : vector<8x192xf32>
    %63 = tpu.matmul %62, %6, %cst_17 {dimension_numbers = #tpu.dot_dimension_numbers<[1], [0], [0], [1], [0, 0, 1, 1], [], []>} : vector<8x64xbf16>, vector<64x192xbf16>, vector<8x192xf32> -> vector<8x192xf32>
    %64 = vector.extract_strided_slice %61 {offsets = [0, 0], sizes = [8, 128], strides = [1, 1]} : vector<8x192xf32> to vector<8x128xf32>
    %65 = vector.extract_strided_slice %63 {offsets = [0, 0], sizes = [8, 128], strides = [1, 1]} : vector<8x192xf32> to vector<8x128xf32>
    %66 = arith.addf %64, %65 : vector<8x128xf32>
    %67 = arith.negf %66 : vector<8x128xf32>
    %68 = math.exp %67 : vector<8x128xf32>
    %cst_18 = arith.constant 1.000000e+00 : f32
    %69 = vector.broadcast %cst_18 : f32 to vector<8x128xf32>
    %70 = arith.addf %69, %68 : vector<8x128xf32>
    %71 = arith.divf %69, %70 : vector<8x128xf32>
    %72 = vector.extract_strided_slice %71 {offsets = [0, 0], sizes = [8, 64], strides = [1, 1]} : vector<8x128xf32> to vector<8x64xf32>
    %73 = vector.extract_strided_slice %71 {offsets = [0, 64], sizes = [8, 64], strides = [1, 1]} : vector<8x128xf32> to vector<8x64xf32>
    %74 = vector.extract_strided_slice %61 {offsets = [0, 128], sizes = [8, 64], strides = [1, 1]} : vector<8x192xf32> to vector<8x64xf32>
    %75 = vector.extract_strided_slice %63 {offsets = [0, 128], sizes = [8, 64], strides = [1, 1]} : vector<8x192xf32> to vector<8x64xf32>
    %76 = arith.addf %75, %9 : vector<8x64xf32>
    %77 = arith.mulf %72, %76 : vector<8x64xf32>
    %78 = arith.addf %74, %77 : vector<8x64xf32>
    %79 = math.tanh %78 : vector<8x64xf32>
    %cst_19 = arith.constant 1.000000e+00 : f32
    %80 = vector.broadcast %cst_19 : f32 to vector<8x64xf32>
    %81 = arith.subf %80, %73 : vector<8x64xf32>
    %82 = arith.mulf %81, %79 : vector<8x64xf32>
    %83 = arith.mulf %73, %58 : vector<8x64xf32>
    %84 = arith.addf %82, %83 : vector<8x64xf32>
    %85 = vector.extract_strided_slice %5 {offsets = [16, 0], sizes = [8, 192], strides = [1, 1]} : vector<64x192xf32> to vector<8x192xf32>
    %86 = vector.extract_strided_slice %5 {offsets = [40, 0], sizes = [8, 192], strides = [1, 1]} : vector<64x192xf32> to vector<8x192xf32>
    %87 = arith.select %28, %85, %86 : vector<8x192xi1>, vector<8x192xf32>
    %88 = arith.truncf %84 : vector<8x64xf32> to vector<8x64xbf16>
    %cst_20 = arith.constant dense<0.000000e+00> : vector<8x192xf32>
    %89 = tpu.matmul %88, %6, %cst_20 {dimension_numbers = #tpu.dot_dimension_numbers<[1], [0], [0], [1], [0, 0, 1, 1], [], []>} : vector<8x64xbf16>, vector<64x192xbf16>, vector<8x192xf32> -> vector<8x192xf32>
    %90 = vector.extract_strided_slice %87 {offsets = [0, 0], sizes = [8, 128], strides = [1, 1]} : vector<8x192xf32> to vector<8x128xf32>
    %91 = vector.extract_strided_slice %89 {offsets = [0, 0], sizes = [8, 128], strides = [1, 1]} : vector<8x192xf32> to vector<8x128xf32>
    %92 = arith.addf %90, %91 : vector<8x128xf32>
    %93 = arith.negf %92 : vector<8x128xf32>
    %94 = math.exp %93 : vector<8x128xf32>
    %cst_21 = arith.constant 1.000000e+00 : f32
    %95 = vector.broadcast %cst_21 : f32 to vector<8x128xf32>
    %96 = arith.addf %95, %94 : vector<8x128xf32>
    %97 = arith.divf %95, %96 : vector<8x128xf32>
    %98 = vector.extract_strided_slice %97 {offsets = [0, 0], sizes = [8, 64], strides = [1, 1]} : vector<8x128xf32> to vector<8x64xf32>
    %99 = vector.extract_strided_slice %97 {offsets = [0, 64], sizes = [8, 64], strides = [1, 1]} : vector<8x128xf32> to vector<8x64xf32>
    %100 = vector.extract_strided_slice %87 {offsets = [0, 128], sizes = [8, 64], strides = [1, 1]} : vector<8x192xf32> to vector<8x64xf32>
    %101 = vector.extract_strided_slice %89 {offsets = [0, 128], sizes = [8, 64], strides = [1, 1]} : vector<8x192xf32> to vector<8x64xf32>
    %102 = arith.addf %101, %9 : vector<8x64xf32>
    %103 = arith.mulf %98, %102 : vector<8x64xf32>
    %104 = arith.addf %100, %103 : vector<8x64xf32>
    %105 = math.tanh %104 : vector<8x64xf32>
    %cst_22 = arith.constant 1.000000e+00 : f32
    %106 = vector.broadcast %cst_22 : f32 to vector<8x64xf32>
    %107 = arith.subf %106, %99 : vector<8x64xf32>
    %108 = arith.mulf %107, %105 : vector<8x64xf32>
    %109 = arith.mulf %99, %84 : vector<8x64xf32>
    %110 = arith.addf %108, %109 : vector<8x64xf32>
    %111 = vector.extract_strided_slice %5 {offsets = [24, 0], sizes = [8, 192], strides = [1, 1]} : vector<64x192xf32> to vector<8x192xf32>
    %112 = vector.extract_strided_slice %5 {offsets = [32, 0], sizes = [8, 192], strides = [1, 1]} : vector<64x192xf32> to vector<8x192xf32>
    %113 = arith.select %28, %111, %112 : vector<8x192xi1>, vector<8x192xf32>
    %114 = arith.truncf %110 : vector<8x64xf32> to vector<8x64xbf16>
    %cst_23 = arith.constant dense<0.000000e+00> : vector<8x192xf32>
    %115 = tpu.matmul %114, %6, %cst_23 {dimension_numbers = #tpu.dot_dimension_numbers<[1], [0], [0], [1], [0, 0, 1, 1], [], []>} : vector<8x64xbf16>, vector<64x192xbf16>, vector<8x192xf32> -> vector<8x192xf32>
    %116 = vector.extract_strided_slice %113 {offsets = [0, 0], sizes = [8, 128], strides = [1, 1]} : vector<8x192xf32> to vector<8x128xf32>
    %117 = vector.extract_strided_slice %115 {offsets = [0, 0], sizes = [8, 128], strides = [1, 1]} : vector<8x192xf32> to vector<8x128xf32>
    %118 = arith.addf %116, %117 : vector<8x128xf32>
    %119 = arith.negf %118 : vector<8x128xf32>
    %120 = math.exp %119 : vector<8x128xf32>
    %cst_24 = arith.constant 1.000000e+00 : f32
    %121 = vector.broadcast %cst_24 : f32 to vector<8x128xf32>
    %122 = arith.addf %121, %120 : vector<8x128xf32>
    %123 = arith.divf %121, %122 : vector<8x128xf32>
    %124 = vector.extract_strided_slice %123 {offsets = [0, 0], sizes = [8, 64], strides = [1, 1]} : vector<8x128xf32> to vector<8x64xf32>
    %125 = vector.extract_strided_slice %123 {offsets = [0, 64], sizes = [8, 64], strides = [1, 1]} : vector<8x128xf32> to vector<8x64xf32>
    %126 = vector.extract_strided_slice %113 {offsets = [0, 128], sizes = [8, 64], strides = [1, 1]} : vector<8x192xf32> to vector<8x64xf32>
    %127 = vector.extract_strided_slice %115 {offsets = [0, 128], sizes = [8, 64], strides = [1, 1]} : vector<8x192xf32> to vector<8x64xf32>
    %128 = arith.addf %127, %9 : vector<8x64xf32>
    %129 = arith.mulf %124, %128 : vector<8x64xf32>
    %130 = arith.addf %126, %129 : vector<8x64xf32>
    %131 = math.tanh %130 : vector<8x64xf32>
    %cst_25 = arith.constant 1.000000e+00 : f32
    %132 = vector.broadcast %cst_25 : f32 to vector<8x64xf32>
    %133 = arith.subf %132, %125 : vector<8x64xf32>
    %134 = arith.mulf %133, %131 : vector<8x64xf32>
    %135 = arith.mulf %125, %110 : vector<8x64xf32>
    %136 = arith.addf %134, %135 : vector<8x64xf32>
    %137 = vector.extract_strided_slice %5 {offsets = [32, 0], sizes = [8, 192], strides = [1, 1]} : vector<64x192xf32> to vector<8x192xf32>
    %138 = vector.extract_strided_slice %5 {offsets = [24, 0], sizes = [8, 192], strides = [1, 1]} : vector<64x192xf32> to vector<8x192xf32>
    %139 = arith.select %28, %137, %138 : vector<8x192xi1>, vector<8x192xf32>
    %140 = arith.truncf %136 : vector<8x64xf32> to vector<8x64xbf16>
    %cst_26 = arith.constant dense<0.000000e+00> : vector<8x192xf32>
    %141 = tpu.matmul %140, %6, %cst_26 {dimension_numbers = #tpu.dot_dimension_numbers<[1], [0], [0], [1], [0, 0, 1, 1], [], []>} : vector<8x64xbf16>, vector<64x192xbf16>, vector<8x192xf32> -> vector<8x192xf32>
    %142 = vector.extract_strided_slice %139 {offsets = [0, 0], sizes = [8, 128], strides = [1, 1]} : vector<8x192xf32> to vector<8x128xf32>
    %143 = vector.extract_strided_slice %141 {offsets = [0, 0], sizes = [8, 128], strides = [1, 1]} : vector<8x192xf32> to vector<8x128xf32>
    %144 = arith.addf %142, %143 : vector<8x128xf32>
    %145 = arith.negf %144 : vector<8x128xf32>
    %146 = math.exp %145 : vector<8x128xf32>
    %cst_27 = arith.constant 1.000000e+00 : f32
    %147 = vector.broadcast %cst_27 : f32 to vector<8x128xf32>
    %148 = arith.addf %147, %146 : vector<8x128xf32>
    %149 = arith.divf %147, %148 : vector<8x128xf32>
    %150 = vector.extract_strided_slice %149 {offsets = [0, 0], sizes = [8, 64], strides = [1, 1]} : vector<8x128xf32> to vector<8x64xf32>
    %151 = vector.extract_strided_slice %149 {offsets = [0, 64], sizes = [8, 64], strides = [1, 1]} : vector<8x128xf32> to vector<8x64xf32>
    %152 = vector.extract_strided_slice %139 {offsets = [0, 128], sizes = [8, 64], strides = [1, 1]} : vector<8x192xf32> to vector<8x64xf32>
    %153 = vector.extract_strided_slice %141 {offsets = [0, 128], sizes = [8, 64], strides = [1, 1]} : vector<8x192xf32> to vector<8x64xf32>
    %154 = arith.addf %153, %9 : vector<8x64xf32>
    %155 = arith.mulf %150, %154 : vector<8x64xf32>
    %156 = arith.addf %152, %155 : vector<8x64xf32>
    %157 = math.tanh %156 : vector<8x64xf32>
    %cst_28 = arith.constant 1.000000e+00 : f32
    %158 = vector.broadcast %cst_28 : f32 to vector<8x64xf32>
    %159 = arith.subf %158, %151 : vector<8x64xf32>
    %160 = arith.mulf %159, %157 : vector<8x64xf32>
    %161 = arith.mulf %151, %136 : vector<8x64xf32>
    %162 = arith.addf %160, %161 : vector<8x64xf32>
    %163 = vector.extract_strided_slice %5 {offsets = [40, 0], sizes = [8, 192], strides = [1, 1]} : vector<64x192xf32> to vector<8x192xf32>
    %164 = vector.extract_strided_slice %5 {offsets = [16, 0], sizes = [8, 192], strides = [1, 1]} : vector<64x192xf32> to vector<8x192xf32>
    %165 = arith.select %28, %163, %164 : vector<8x192xi1>, vector<8x192xf32>
    %166 = arith.truncf %162 : vector<8x64xf32> to vector<8x64xbf16>
    %cst_29 = arith.constant dense<0.000000e+00> : vector<8x192xf32>
    %167 = tpu.matmul %166, %6, %cst_29 {dimension_numbers = #tpu.dot_dimension_numbers<[1], [0], [0], [1], [0, 0, 1, 1], [], []>} : vector<8x64xbf16>, vector<64x192xbf16>, vector<8x192xf32> -> vector<8x192xf32>
    %168 = vector.extract_strided_slice %165 {offsets = [0, 0], sizes = [8, 128], strides = [1, 1]} : vector<8x192xf32> to vector<8x128xf32>
    %169 = vector.extract_strided_slice %167 {offsets = [0, 0], sizes = [8, 128], strides = [1, 1]} : vector<8x192xf32> to vector<8x128xf32>
    %170 = arith.addf %168, %169 : vector<8x128xf32>
    %171 = arith.negf %170 : vector<8x128xf32>
    %172 = math.exp %171 : vector<8x128xf32>
    %cst_30 = arith.constant 1.000000e+00 : f32
    %173 = vector.broadcast %cst_30 : f32 to vector<8x128xf32>
    %174 = arith.addf %173, %172 : vector<8x128xf32>
    %175 = arith.divf %173, %174 : vector<8x128xf32>
    %176 = vector.extract_strided_slice %175 {offsets = [0, 0], sizes = [8, 64], strides = [1, 1]} : vector<8x128xf32> to vector<8x64xf32>
    %177 = vector.extract_strided_slice %175 {offsets = [0, 64], sizes = [8, 64], strides = [1, 1]} : vector<8x128xf32> to vector<8x64xf32>
    %178 = vector.extract_strided_slice %165 {offsets = [0, 128], sizes = [8, 64], strides = [1, 1]} : vector<8x192xf32> to vector<8x64xf32>
    %179 = vector.extract_strided_slice %167 {offsets = [0, 128], sizes = [8, 64], strides = [1, 1]} : vector<8x192xf32> to vector<8x64xf32>
    %180 = arith.addf %179, %9 : vector<8x64xf32>
    %181 = arith.mulf %176, %180 : vector<8x64xf32>
    %182 = arith.addf %178, %181 : vector<8x64xf32>
    %183 = math.tanh %182 : vector<8x64xf32>
    %cst_31 = arith.constant 1.000000e+00 : f32
    %184 = vector.broadcast %cst_31 : f32 to vector<8x64xf32>
    %185 = arith.subf %184, %177 : vector<8x64xf32>
    %186 = arith.mulf %185, %183 : vector<8x64xf32>
    %187 = arith.mulf %177, %162 : vector<8x64xf32>
    %188 = arith.addf %186, %187 : vector<8x64xf32>
    %189 = vector.extract_strided_slice %5 {offsets = [48, 0], sizes = [8, 192], strides = [1, 1]} : vector<64x192xf32> to vector<8x192xf32>
    %190 = vector.extract_strided_slice %5 {offsets = [8, 0], sizes = [8, 192], strides = [1, 1]} : vector<64x192xf32> to vector<8x192xf32>
    %191 = arith.select %28, %189, %190 : vector<8x192xi1>, vector<8x192xf32>
    %192 = arith.truncf %188 : vector<8x64xf32> to vector<8x64xbf16>
    %cst_32 = arith.constant dense<0.000000e+00> : vector<8x192xf32>
    %193 = tpu.matmul %192, %6, %cst_32 {dimension_numbers = #tpu.dot_dimension_numbers<[1], [0], [0], [1], [0, 0, 1, 1], [], []>} : vector<8x64xbf16>, vector<64x192xbf16>, vector<8x192xf32> -> vector<8x192xf32>
    %194 = vector.extract_strided_slice %191 {offsets = [0, 0], sizes = [8, 128], strides = [1, 1]} : vector<8x192xf32> to vector<8x128xf32>
    %195 = vector.extract_strided_slice %193 {offsets = [0, 0], sizes = [8, 128], strides = [1, 1]} : vector<8x192xf32> to vector<8x128xf32>
    %196 = arith.addf %194, %195 : vector<8x128xf32>
    %197 = arith.negf %196 : vector<8x128xf32>
    %198 = math.exp %197 : vector<8x128xf32>
    %cst_33 = arith.constant 1.000000e+00 : f32
    %199 = vector.broadcast %cst_33 : f32 to vector<8x128xf32>
    %200 = arith.addf %199, %198 : vector<8x128xf32>
    %201 = arith.divf %199, %200 : vector<8x128xf32>
    %202 = vector.extract_strided_slice %201 {offsets = [0, 0], sizes = [8, 64], strides = [1, 1]} : vector<8x128xf32> to vector<8x64xf32>
    %203 = vector.extract_strided_slice %201 {offsets = [0, 64], sizes = [8, 64], strides = [1, 1]} : vector<8x128xf32> to vector<8x64xf32>
    %204 = vector.extract_strided_slice %191 {offsets = [0, 128], sizes = [8, 64], strides = [1, 1]} : vector<8x192xf32> to vector<8x64xf32>
    %205 = vector.extract_strided_slice %193 {offsets = [0, 128], sizes = [8, 64], strides = [1, 1]} : vector<8x192xf32> to vector<8x64xf32>
    %206 = arith.addf %205, %9 : vector<8x64xf32>
    %207 = arith.mulf %202, %206 : vector<8x64xf32>
    %208 = arith.addf %204, %207 : vector<8x64xf32>
    %209 = math.tanh %208 : vector<8x64xf32>
    %cst_34 = arith.constant 1.000000e+00 : f32
    %210 = vector.broadcast %cst_34 : f32 to vector<8x64xf32>
    %211 = arith.subf %210, %203 : vector<8x64xf32>
    %212 = arith.mulf %211, %209 : vector<8x64xf32>
    %213 = arith.mulf %203, %188 : vector<8x64xf32>
    %214 = arith.addf %212, %213 : vector<8x64xf32>
    %215 = vector.extract_strided_slice %5 {offsets = [56, 0], sizes = [8, 192], strides = [1, 1]} : vector<64x192xf32> to vector<8x192xf32>
    %216 = vector.extract_strided_slice %5 {offsets = [0, 0], sizes = [8, 192], strides = [1, 1]} : vector<64x192xf32> to vector<8x192xf32>
    %217 = arith.select %28, %215, %216 : vector<8x192xi1>, vector<8x192xf32>
    %218 = arith.truncf %214 : vector<8x64xf32> to vector<8x64xbf16>
    %cst_35 = arith.constant dense<0.000000e+00> : vector<8x192xf32>
    %219 = tpu.matmul %218, %6, %cst_35 {dimension_numbers = #tpu.dot_dimension_numbers<[1], [0], [0], [1], [0, 0, 1, 1], [], []>} : vector<8x64xbf16>, vector<64x192xbf16>, vector<8x192xf32> -> vector<8x192xf32>
    %220 = vector.extract_strided_slice %217 {offsets = [0, 0], sizes = [8, 128], strides = [1, 1]} : vector<8x192xf32> to vector<8x128xf32>
    %221 = vector.extract_strided_slice %219 {offsets = [0, 0], sizes = [8, 128], strides = [1, 1]} : vector<8x192xf32> to vector<8x128xf32>
    %222 = arith.addf %220, %221 : vector<8x128xf32>
    %223 = arith.negf %222 : vector<8x128xf32>
    %224 = math.exp %223 : vector<8x128xf32>
    %cst_36 = arith.constant 1.000000e+00 : f32
    %225 = vector.broadcast %cst_36 : f32 to vector<8x128xf32>
    %226 = arith.addf %225, %224 : vector<8x128xf32>
    %227 = arith.divf %225, %226 : vector<8x128xf32>
    %228 = vector.extract_strided_slice %227 {offsets = [0, 0], sizes = [8, 64], strides = [1, 1]} : vector<8x128xf32> to vector<8x64xf32>
    %229 = vector.extract_strided_slice %227 {offsets = [0, 64], sizes = [8, 64], strides = [1, 1]} : vector<8x128xf32> to vector<8x64xf32>
    %230 = vector.extract_strided_slice %217 {offsets = [0, 128], sizes = [8, 64], strides = [1, 1]} : vector<8x192xf32> to vector<8x64xf32>
    %231 = vector.extract_strided_slice %219 {offsets = [0, 128], sizes = [8, 64], strides = [1, 1]} : vector<8x192xf32> to vector<8x64xf32>
    %232 = arith.addf %231, %9 : vector<8x64xf32>
    %233 = arith.mulf %228, %232 : vector<8x64xf32>
    %234 = arith.addf %230, %233 : vector<8x64xf32>
    %235 = math.tanh %234 : vector<8x64xf32>
    %cst_37 = arith.constant 1.000000e+00 : f32
    %236 = vector.broadcast %cst_37 : f32 to vector<8x64xf32>
    %237 = arith.subf %236, %229 : vector<8x64xf32>
    %238 = arith.mulf %237, %235 : vector<8x64xf32>
    %239 = arith.mulf %229, %214 : vector<8x64xf32>
    %240 = arith.addf %238, %239 : vector<8x64xf32>
    %241 = vector.extract_strided_slice %240 {offsets = [0, 0], sizes = [8, 32], strides = [1, 1]} : vector<8x64xf32> to vector<8x32xf32>
    %c0_38 = arith.constant 0 : index
    %c0_39 = arith.constant 0 : index
    %242 = vector.load %arg8[%c0_38, %c0_39] : memref<16x32xf32, #tpu.memory_space<vmem>>, vector<8x32xf32>
    tpu.vector_store %arg8[%c0_38, %c0_39], %241 {strides = array<i32>} : memref<16x32xf32, #tpu.memory_space<vmem>>, vector<8x32xf32>,
    %243 = vector.extract_strided_slice %240 {offsets = [0, 32], sizes = [8, 32], strides = [1, 1]} : vector<8x64xf32> to vector<8x32xf32>
    %c8 = arith.constant 8 : index
    %c0_40 = arith.constant 0 : index
    %244 = vector.load %arg8[%c8, %c0_40] : memref<16x32xf32, #tpu.memory_space<vmem>>, vector<8x32xf32>
    tpu.vector_store %arg8[%c8, %c0_40], %243 {strides = array<i32>} : memref<16x32xf32, #tpu.memory_space<vmem>>, vector<8x32xf32>,
    %245 = arith.select %31, %58, %240 : vector<8x64xi1>, vector<8x64xf32>
    %246 = arith.select %31, %84, %214 : vector<8x64xi1>, vector<8x64xf32>
    %247 = arith.select %31, %110, %188 : vector<8x64xi1>, vector<8x64xf32>
    %248 = arith.select %31, %136, %162 : vector<8x64xi1>, vector<8x64xf32>
    %249 = arith.select %31, %162, %136 : vector<8x64xi1>, vector<8x64xf32>
    %250 = arith.select %31, %188, %110 : vector<8x64xi1>, vector<8x64xf32>
    %251 = arith.select %31, %214, %84 : vector<8x64xi1>, vector<8x64xf32>
    %252 = arith.select %31, %240, %58 : vector<8x64xi1>, vector<8x64xf32>
    %253 = tpu.concatenate %245, %246, %247, %248, %249, %250, %251, %252 in 0 : vector<8x64xf32>, vector<8x64xf32>, vector<8x64xf32>, vector<8x64xf32>, vector<8x64xf32>, vector<8x64xf32>, vector<8x64xf32>, vector<8x64xf32> -> vector<64x64xf32>
    %254 = arith.truncf %253 : vector<64x64xf32> to vector<64x64xbf16>
    %c0_41 = arith.constant 0 : index
    %c0_42 = arith.constant 0 : index
    %255 = vector.load %arg5[%c0_41, %c0_42] : memref<64x32xbf16, #tpu.memory_space<vmem>>, vector<64x32xbf16>
    %cst_43 = arith.constant dense<0.000000e+00> : vector<64x32xf32>
    %256 = tpu.matmul %254, %255, %cst_43 {dimension_numbers = #tpu.dot_dimension_numbers<[1], [0], [0], [1], [0, 0, 1, 1], [], []>} : vector<64x64xbf16>, vector<64x32xbf16>, vector<64x32xf32> -> vector<64x32xf32>
    %c0_44 = arith.constant 0 : index
    %c0_45 = arith.constant 0 : index
    %257 = vector.load %arg6[%c0_44, %c0_45] : memref<1x32xf32, #tpu.memory_space<vmem>>, vector<1x32xf32>
    %258 = vector.broadcast %257 : vector<1x32xf32> to vector<64x32xf32>
    %259 = arith.addf %256, %258 : vector<64x32xf32>
    %cst_46 = arith.constant 0.000000e+00 : f32
    %260 = vector.broadcast %cst_46 : f32 to vector<64x32xf32>
    %261 = arith.maximumf %259, %260 : vector<64x32xf32>
    %c0_47 = arith.constant 0 : index
    %c0_48 = arith.constant 0 : index
    %262 = vector.load %arg7[%c0_47, %c0_48] : memref<64x32xf32, #tpu.memory_space<vmem>>, vector<64x32xf32>
    tpu.vector_store %arg7[%c0_47, %c0_48], %261 {strides = array<i32>} : memref<64x32xf32, #tpu.memory_space<vmem>>, vector<64x32xf32>,
    return
  }
}

</mosaic_0001>

<bundles_post_ra>
// kernel: gru_forward.1
= control target key start
LH: loop header
LB: loop body
LE: loop exit
PB: predicated region body
PF: predicated region fallthrough
CT: control target
= control target key end

     0   :  { %vm75_vm0 = vcmask 130048   ;;  %v1107_v34 = vmov 0   ;;  %v158_v36 = vlaneseq  ;;  %vm230_vm7 = vcmask 523264   ;;  %s1109_s30 = smov 32   ;;  %s1662_s1 = inlined_call_operand.vmem [shape: bf16[16,192], index: 1, kind: input, shape index: {}]   ;;  %s1663_s0 = inlined_call_operand.vmem [shape: bf16[64,16], index: 0, kind: input, shape index: {}]   ;;  %s1664_s3 = inlined_call_operand.vmem [shape: bf16[64,192], index: 3, kind: input, shape index: {}]   ;;  %s1665_s4 = inlined_call_operand.vmem [shape: f32[1,64], index: 4, kind: input, shape index: {}]   ;;  %s1666_s2 = inlined_call_operand.vmem [shape: f32[1,192], index: 2, kind: input, shape index: {}]   ;;  %s1667_s6 = inlined_call_operand.vmem [shape: f32[1,32], index: 6, kind: input, shape index: {}]   ;;  %s1668_s5 = inlined_call_operand.vmem [shape: bf16[64,32], index: 5, kind: input, shape index: {}]   ;;  %s1669_s8 = inlined_call_operand.vmem [shape: f32[16,32], index: 8, kind: output, shape index: {1}]   ;;  %s1670_s7 = inlined_call_operand.vmem [shape: f32[64,32], index: 7, kind: output, shape index: {0}]  }
   0x1   :  { %v930_v0 = vld [vmem:[%s1662_s1] sm:$0xf]  ;;  %v1023_v1 = vld [vmem:[%s1662_s1 + $0x4] sm:$0xf0]  ;;  %v1022_v4 = vld [vmem:[%s1662_s1 + $0x4] sm:$0xf] }
   0x2   :  { %v931_v2 = vor.u32 %v1023_v1, %v930_v0  ;;  %v1164_v3 = vld [vmem:[%s1663_s0 + $0x8] sm:$0xff]  ;;  %v1175_v6 = vld [vmem:[%s1663_s0 + $0x10] sm:$0xff]  ;;  %v1031_v9 = vld [vmem:[%s1664_s3 + $0x34] sm:$0xf0]  ;;  %v1306_v39 = vand.u32 127, %v158_v36 }
   0x3   :  { %v932_v5 = vld [vmem:[%s1662_s1 + $0x8] sm:$0xf0]  ;;  %v970_v8 = vld [vmem:[%s1664_s3 + $0x30] sm:$0xf]  ;;  %v1188_v11 = vld [vmem:[%s1663_s0 + $0x18] sm:$0xff] }
   0x4   :  { %v935_v7 = vor.u32 %v1022_v4, %v932_v5  ;;  %1036 = vmatpush.bf16.msra.mxu1 %v931_v2  ;;  %1037 = vmatpush.bf16.msra.mxu2 %v931_v2  ;;  %v1183_v10 = vor.u32 %v1031_v9, %v970_v8  ;;  %v962_v12 = vld [vmem:[%s1664_s3 + $0x20] sm:$0xf]  ;;  %v1029_v13 = vld [vmem:[%s1664_s3 + $0x24] sm:$0xf0]  ;;  %v954_v14 = vld [vmem:[%s1664_s3 + $0x10] sm:$0xf] }
   0x5   :  { %1038 = vmatpush.bf16.msra.mxu3 %v931_v2  ;;  %v1200_v15 = vor.u32 %v1029_v13, %v962_v12  ;;  %v1027_v16 = vld [vmem:[%s1664_s3 + $0x14] sm:$0xf0]  ;;  %95 = vmatpush.bf16.msra.mxu0 %v931_v2  ;;  %v1030_v17 = vld [vmem:[%s1664_s3 + $0x34] sm:$0xf]  ;;  %v972_v18 = vld [vmem:[%s1664_s3 + $0x38] sm:$0xf0] }
   0x6   :  { %v1018_v19 = vld [vmem:[%s1663_s0] sm:$0xff]  ;;  %v1218_v20 = vor.u32 %v1030_v17, %v972_v18  ;;  %v964_v22 = vld [vmem:[%s1664_s3 + $0x28] sm:$0xf0]  ;;  %v1234_v24 = vor.u32 %v1027_v16, %v954_v14  ;;  %v1026_v25 = vld [vmem:[%s1664_s3 + $0x14] sm:$0xf]  ;;  %v165_v42 = vand.u32 63, %v1306_v39 }
   0x7   :  { %937 = vmatmul.msk.bf16.vlgmr.msra.gmra.mxu1 %vm75_vm0, %v1164_v3  ;;  %938 = vmatmul.msk.bf16.vlgmr.msra.gmra.mxu2 %vm75_vm0, %v1175_v6  ;;  %v1028_v21 = vld [vmem:[%s1664_s3 + $0x24] sm:$0xf]  ;;  %v956_v26 = vld [vmem:[%s1664_s3 + $0x18] sm:$0xf0]  ;;  %v946_v27 = vld [vmem:[%s1664_s3] sm:$0xf] }
   0x8   :  { %124 = vmatpush.bf16.msrb.mxu1 %v935_v7  ;;  %238 = vmatpush.bf16.msrb.mxu2 %v1183_v10  ;;  %v1231_v23 = vor.u32 %v1028_v21, %v964_v22  ;;  %v1025_v28 = vld [vmem:[%s1664_s3 + $0x4] sm:$0xf0]  ;;  %v1251_v29 = vor.u32 %v1026_v25, %v956_v26  ;;  %v1024_v31 = vld [vmem:[%s1664_s3 + $0x4] sm:$0xf]  ;;  %v948_v32 = vld [vmem:[%s1664_s3 + $0x8] sm:$0xf0] }
   0x9   :  { %939 = vmatmul.msk.bf16.vlgmr.msra.gmra.mxu3 %vm75_vm0, %v1188_v11  ;;  %506 = vmatpush.bf16.msrb.mxu0 %v1183_v10  ;;  %v1254_v30 = vor.u32 %v1025_v28, %v946_v27  ;;  %v1265_v33 = vor.u32 %v1024_v31, %v948_v32  ;;  %v39_v35 = vld [vmem:[%s1666_s2] sm:$0x3]  ;;  %vm1315_vm1 = vcmp.lt.s32.totalorder %v165_v42, 32  ;;  %v160_v18 = vadd.s32 128, %v1306_v39 }
   0xa   :  { %936 = vmatmul.msk.bf16.vlgmr.msra.gmra.mxu0 %vm75_vm0, %v1018_v19  ;;  %251 = vmatpush.bf16.msrb.mxu3 %v1218_v20  ;;  %v41_v37 = vperm.slane %v39_v35, 0 }
   0xb   :  { %v172_v21 = vand.u32 63, %v160_v18 }
   0xc   :  { %239 = vmatpush.bf16.msrb.mxu2 %v1200_v15  ;;  %519 = vmatpush.bf16.msra.mxu1 %v1218_v20 }
   0xd   :  { %507 = vmatpush.bf16.msrb.mxu0 %v1200_v15  ;;  %vm1368_vm2 = vcmp.lt.s32.totalorder %v172_v21, 32 }
   0xe   :  { %252 = vmatpush.bf16.msrb.mxu3 %v1231_v23 }
  0x10   :  { %240 = vmatpush.bf16.msrb.mxu2 %v1234_v24  ;;  %520 = vmatpush.bf16.msra.mxu1 %v1231_v23 }
  0x11   :  { %508 = vmatpush.bf16.msrb.mxu0 %v1234_v24 }
  0x12   :  { %253 = vmatpush.bf16.msrb.mxu3 %v1251_v29 }
  0x14   :  { %241 = vmatpush.bf16.msrb.mxu2 %v1254_v30  ;;  %521 = vmatpush.bf16.msra.mxu1 %v1251_v29 }
  0x15   :  { %509 = vmatpush.bf16.msrb.mxu0 %v1254_v30 }
  0x16   :  { %254 = vmatpush.bf16.msrb.mxu3 %v1265_v33 }
  0x17   :  { %940 = vmatmul.msk.bf16.vlgmr.msrb.gmra.mxu1 %vm75_vm0, %v1018_v19  ;;  %242 = vmatmul.bf16.vlgmr.msrb.gmra.mxu2 %v1107_v34 }
  0x18   :  { %305 = vmatpush.bf16.msra.mxu2 %v1183_v10  ;;  %522 = vmatpush.bf16.msra.mxu1 %v1265_v33 }
  0x19   :  { %640 = vmatpush.bf16.msra.mxu0 %v1183_v10  ;;  %255 = vmatmul.bf16.vlgmr.msrb.gmra.mxu3 %v1107_v34 }
  0x1a   :  { %318 = vmatpush.bf16.msra.mxu3 %v1218_v20 }
  0x1c   :  { %306 = vmatpush.bf16.msra.mxu2 %v1200_v15  ;;  %653 = vmatpush.bf16.msrb.mxu1 %v1218_v20 }
  0x1d   :  { %641 = vmatpush.bf16.msra.mxu0 %v1200_v15 }
  0x1e   :  { %319 = vmatpush.bf16.msra.mxu3 %v1231_v23 }
  0x20   :  { %307 = vmatpush.bf16.msra.mxu2 %v1234_v24  ;;  %654 = vmatpush.bf16.msrb.mxu1 %v1231_v23 }
  0x21   :  { %642 = vmatpush.bf16.msra.mxu0 %v1234_v24 }
  0x22   :  { %320 = vmatpush.bf16.msra.mxu3 %v1251_v29 }
  0x24   :  { %308 = vmatpush.bf16.msra.mxu2 %v1254_v30  ;;  %655 = vmatpush.bf16.msrb.mxu1 %v1251_v29 }
  0x25   :  { %643 = vmatpush.bf16.msra.mxu0 %v1254_v30 }
  0x26   :  { %321 = vmatpush.bf16.msra.mxu3 %v1265_v33 }
  0x27   :  { %941 = vmatmul.msk.bf16.gmra.mxu1 %vm75_vm0, %v1164_v3  ;;  %v42_v3 = vperm.slane %v39_v35, 1 }
  0x28   :  { %372 = vmatpush.bf16.msrb.mxu2 %v1183_v10  ;;  %656 = vmatpush.bf16.msrb.mxu1 %v1265_v33 }
  0x2a   :  { %385 = vmatpush.bf16.msrb.mxu3 %v1218_v20 }
  0x2c   :  { %373 = vmatpush.bf16.msrb.mxu2 %v1200_v15 }
  0x2e   :  { %386 = vmatpush.bf16.msrb.mxu3 %v1231_v23 }
  0x30   :  { %374 = vmatpush.bf16.msrb.mxu2 %v1234_v24 }
  0x32   :  { %387 = vmatpush.bf16.msrb.mxu3 %v1251_v29 }
  0x34   :  { %375 = vmatpush.bf16.msrb.mxu2 %v1254_v30 }
  0x36   :  { %388 = vmatpush.bf16.msrb.mxu3 %v1265_v33 }
  0x37   :  { %942 = vmatmul.msk.bf16.gmra.mxu1 %vm75_vm0, %v1175_v6 }
  0x47   :  { %943 = vmatmul.msk.bf16.gmra.mxu1 %vm75_vm0, %v1188_v11 }
  0x84   :  { %v102_v38 = vpop.f32.mrf.mxu1 }
  0x85   :  { %v1308_v40 = vadd.f32 %v102_v38, %v41_v37 }
  0x87   :  { %v97_v41 = vpop.f32.mrf.mxu0 }
  0x88   :  { %v1341_v60 = vadd.f32 %v97_v41, %v41_v37 }
  0x8a   :  { %v107_v43 = vpop.f32.mrf.mxu2 }
  0x8b   :  { %v1311_v44 = vadd.f32 %v107_v43, %v41_v37 }
  0x8c   :  { %v112_v45 = vpop.f32.mrf.mxu3  ;;  %v104_v46 = vpop.f32.mrf.mxu1 }
  0x8d   :  { %v1313_v47 = vadd.f32 %v112_v45, %v41_v37  ;;  %v1319_v49 = vadd.f32 %v104_v46, %v41_v37 }
  0x8f   :  { %v99_v50 = vpop.f32.mrf.mxu0  ;;  %v426_v52 = vsel %vm1315_vm1, %v1319_v49, %v1311_v44  ;;  %v493_v53 = vsel %vm1315_vm1, %v1311_v44, %v1319_v49 }
  0x90   :  { %v1321_v51 = vadd.f32 %v99_v50, %v41_v37 }
  0x92   :  { %v292_v54 = vsel %vm1315_vm1, %v1321_v51, %v1313_v47  ;;  %v627_v55 = vsel %vm1315_vm1, %v1313_v47, %v1321_v51  ;;  %v109_v56 = vpop.f32.mrf.mxu2 }
  0x93   :  { %v1339_v57 = vadd.f32 %v109_v56, %v41_v37  ;;  %v1397_v56 = vld [vmem:[%s1665_s4] ss:$0 sm:$0xff]  ;;  %s1108_s4 = smov 64  }
  0x94   :  { %v114_v58 = vpop.f32.mrf.mxu3  ;;  %v126_v59 = vpop.f32.mrf.mxu1 }
  0x95   :  { %v1343_v61 = vadd.f32 %v114_v58, %v41_v37  ;;  %v359_v62 = vsel %vm1315_vm1, %v1308_v40, %v1339_v57  ;;  %v560_v63 = vsel %vm1315_vm1, %v1339_v57, %v1308_v40 }
  0x97   :  { %v694_v0 = vsel %vm1315_vm1, %v1343_v61, %v1341_v60  ;;  %v188_v1 = vsel %vm1315_vm1, %v1341_v60, %v1343_v61 }
  0x9a   :  { %v243_v2 = vpop.f32.mrf.mxu2 }
  0x9b   :  { %v260_v4 = vadd.f32 %v243_v2, %v188_v1 }
  0x9c   :  { %v256_v5 = vpop.f32.mrf.mxu3  ;;  %v128_v6 = vpop.f32.mrf.mxu1 }
  0x9d   :  { %v1361_v7 = vadd.f32 %v128_v6, %v42_v3  ;;  %v976_v8 = vmul.f32 -1.442695, %v260_v4  ;;  %v280_v6 = vadd.f32 %v1397_v56, %v256_v5 }
  0x9f   :  { %1059 = vpow2.f32 %v976_v8 }
  0xa2   :  { %v245_v9 = vpop.f32.mrf.mxu2 }
  0xa4   :  { %v258_v11 = vpop.f32.mrf.mxu3  ;;  %v131_v12 = vpop.f32.mrf.mxu1 }
  0xa5   :  { %v1363_v13 = vadd.f32 %v131_v12, %v42_v3  ;;  %v1060_v14 = vpop.eup %1059  ;;  %v1408_v11 = vadd.f32 %v126_v59, %v42_v3 }
  0xa6   :  { %v264_v16 = vadd.f32 1.0, %v1060_v14 }
  0xa8   :  { %1061 = vrcp.f32 %v264_v16  ;;  %vm270_vm3 = vweird.f32 %v264_v16  ;;  %v276_v42 = vand.u32 2147483648, %v264_v16  ;;  %v274_v45 = vand.u32 2147483647, %v264_v16 }
  0xaa   :  { %v277_v58 = vor.u32 1.1754944e-38, %v276_v42  ;;  %vm275_vm6 = vcmp.eq.f32.partialorder %v274_v45, 8.507059e+37 }
  0xac   :  { %v133_v17 = vpop.f32.mrf.mxu1 }
  0xad   :  { %v1366_v19 = vadd.f32 %v133_v17, %v42_v3 }
  0xae   :  { %v1062_v26 = vpop.eup %1061 }
  0xaf   :  { %v266_v32 = vmul.f32 %v1062_v26, %v264_v16  ;;  %vm271_vm4 = vweird.f32 %v1062_v26 }
  0xb0   :  { %vm272_vm5 = vmor %vm270_vm3, %vm271_vm4 }
  0xb1   :  { %v267_v34 = vsub.f32 1.0, %v266_v32 }
  0xb3   :  { %v268_v41 = vmul.f32 %v1062_v26, %v267_v34 }
  0xb4   :  { %v136_v22 = vpop.f32.mrf.mxu1 }
  0xb5   :  { %v1372_v27 = vadd.f32 %v136_v22, %v42_v3  ;;  %v269_v43 = vadd.f32 %v1062_v26, %v268_v41 }
  0xb7   :  { %v427_v28 = vsel %vm1368_vm2, %v1366_v19, %v1372_v27  ;;  %v494_v31 = vsel %vm1368_vm2, %v1372_v27, %v1366_v19  ;;  %v273_v4 = vsel %vm272_vm5, %v1062_v26, %v269_v43 }
  0xb8   :  { %v278_v8 = vsel %vm275_vm6, %v277_v58, %v273_v4 }
  0xb9   :  { %v281_v14 = vmul.f32 %v280_v6, %v278_v8  ;;  %v284_v59 = vsub.f32 1.0, %v278_v8  ;;  %v290_v21 = vmul.f32 0.0, %v278_v8 }
  0xbc   :  { %v138_v35 = vpop.f32.mrf.mxu1 }
  0xbd   :  { %v1382_v36 = vadd.f32 %v138_v35, %v42_v3 }
  0xbf   :  { %v360_v37 = vsel %vm1368_vm2, %v1363_v13, %v1382_v36  ;;  %v561_v38 = vsel %vm1368_vm2, %v1382_v36, %v1363_v13 }
  0xc4   :  { %v141_v46 = vpop.f32.mrf.mxu1 }
  0xc5   :  { %v1392_v50 = vadd.f32 %v141_v46, %v42_v3 }
  0xc7   :  { %v293_v1 = vsel %vm1368_vm2, %v1361_v7, %v1392_v50  ;;  %v628_v2 = vsel %vm1368_vm2, %v1392_v50, %v1361_v7 }
  0xcc   :  { %v143_v9 = vpop.f32.mrf.mxu1 }
  0xcd   :  { %v1410_v12 = vadd.f32 %v143_v9, %v42_v3 }
  0xcf   :  { %v189_v16 = vsel %vm1368_vm2, %v1408_v11, %v1410_v12  ;;  %v695_v17 = vsel %vm1368_vm2, %v1410_v12, %v1408_v11  ;;  %v1034_v11 = vld [vmem:[%s1668_s5 + $0x10] sm:$0xff]  ;;  %v1033_v12 = vld [vmem:[%s1668_s5 + $0x8] sm:$0xff]  ;;  %vm765_vm2 = vcmask 261120  }
  0xd0   :  { %v282_v18 = vadd.f32 %v281_v14, %v189_v16 }
  0xd2   :  { %1063 = vtanh.f32 %v282_v18 }
  0xd8   :  { %v1064_v5 = vpop.eup %1063 }
  0xd9   :  { %286 = vrot.lane.b32.xlu0 %v1064_v5, %s1108_s4 }
 0x14b   :  { %v287_v3 = vpop.permute.xlu0 %286 }
 0x14c   :  { %v289_v22 = vmul.f32 %v287_v3, %v284_v59 }
 0x14e   :  { %v1421_v26 = vadd.f32 %v290_v21, %v289_v22 }
 0x150   :  { %v294_v32 = vpack.c.bf16 %v1421_v26, %v1421_v26 }
 0x152   :  { %296 = vrot.lane.b32.xlu0 %v294_v32, %s1108_s4 }
 0x1c4   :  { %v297_v34 = vpop.permute.xlu0 %296 }
 0x1c5   :  { %977 = vmatmul.msk.bf16.vlgmr.msra.gmra.mxu2 %vm230_vm7, %v297_v34  ;;  %978 = vmatmul.msk.bf16.vlgmr.msra.gmra.mxu3 %vm230_vm7, %v297_v34 }
 0x1c6   :  { %439 = vmatpush.bf16.msra.mxu2 %v1183_v10  ;;  %452 = vmatpush.bf16.msra.mxu3 %v1218_v20 }
 0x1ca   :  { %440 = vmatpush.bf16.msra.mxu2 %v1200_v15  ;;  %453 = vmatpush.bf16.msra.mxu3 %v1231_v23 }
 0x1ce   :  { %441 = vmatpush.bf16.msra.mxu2 %v1234_v24  ;;  %454 = vmatpush.bf16.msra.mxu3 %v1251_v29 }
 0x1d2   :  { %442 = vmatpush.bf16.msra.mxu2 %v1254_v30  ;;  %455 = vmatpush.bf16.msra.mxu3 %v1265_v33 }
 0x248   :  { %v310_v35 = vpop.f32.mrf.mxu2  ;;  %v323_v41 = vpop.f32.mrf.mxu3 }
 0x249   :  { %v327_v42 = vadd.f32 %v310_v35, %v292_v54  ;;  %v347_v54 = vadd.f32 %v1397_v56, %v323_v41 }
 0x24b   :  { %v979_v43 = vmul.f32 -1.442695, %v327_v42 }
 0x24d   :  { %1065 = vpow2.f32 %v979_v43 }
 0x250   :  { %v312_v45 = vpop.f32.mrf.mxu2  ;;  %v325_v46 = vpop.f32.mrf.mxu3 }
 0x253   :  { %v1066_v58 = vpop.eup %1065 }
 0x254   :  { %v331_v4 = vadd.f32 1.0, %v1066_v58 }
 0x256   :  { %1067 = vrcp.f32 %v331_v4  ;;  %v343_v14 = vand.u32 2147483648, %v331_v4  ;;  %v341_v18 = vand.u32 2147483647, %v331_v4  ;;  %vm337_vm9 = vweird.f32 %v331_v4 }
 0x258   :  { %v344_v59 = vor.u32 1.1754944e-38, %v343_v14  ;;  %vm342_vm11 = vcmp.eq.f32.partialorder %v341_v18, 8.507059e+37 }
 0x25c   :  { %v1068_v6 = vpop.eup %1067 }
 0x25d   :  { %v333_v8 = vmul.f32 %v1068_v6, %v331_v4  ;;  %vm338_vm8 = vweird.f32 %v1068_v6 }
 0x25e   :  { %vm339_vm10 = vmor %vm337_vm9, %vm338_vm8 }
 0x25f   :  { %v334_v9 = vsub.f32 1.0, %v333_v8 }
 0x261   :  { %v335_v16 = vmul.f32 %v1068_v6, %v334_v9 }
 0x263   :  { %v336_v5 = vadd.f32 %v1068_v6, %v335_v16 }
 0x265   :  { %v340_v3 = vsel %vm339_vm10, %v1068_v6, %v336_v5 }
 0x266   :  { %v345_v21 = vsel %vm342_vm11, %v344_v59, %v340_v3 }
 0x267   :  { %v348_v22 = vmul.f32 %v347_v54, %v345_v21  ;;  %v351_v35 = vsub.f32 1.0, %v345_v21  ;;  %v357_v43 = vmul.f32 %v345_v21, %v1421_v26 }
 0x269   :  { %v349_v32 = vadd.f32 %v348_v22, %v293_v1 }
 0x26b   :  { %1069 = vtanh.f32 %v349_v32 }
 0x271   :  { %v1070_v34 = vpop.eup %1069 }
 0x272   :  { %353 = vrot.lane.b32.xlu1 %v1070_v34, %s1108_s4 }
 0x2e4   :  { %v354_v42 = vpop.permute.xlu1 %353 }
 0x2e5   :  { %v356_v45 = vmul.f32 %v354_v42, %v351_v35 }
 0x2e7   :  { %v1444_v46 = vadd.f32 %v357_v43, %v356_v45 }
 0x2e9   :  { %v361_v58 = vpack.c.bf16 %v1444_v46, %v1444_v46 }
 0x2eb   :  { %363 = vrot.lane.b32.xlu1 %v361_v58, %s1108_s4 }
 0x35d   :  { %v364_v41 = vpop.permute.xlu1 %363 }
 0x35e   :  { %980 = vmatmul.msk.bf16.vlgmr.msrb.gmra.mxu2 %vm230_vm7, %v364_v41  ;;  %981 = vmatmul.msk.bf16.vlgmr.msrb.gmra.mxu3 %vm230_vm7, %v364_v41 }
 0x35f   :  { %573 = vmatpush.bf16.msrb.mxu2 %v1183_v10  ;;  %586 = vmatpush.bf16.msrb.mxu3 %v1218_v20 }
 0x363   :  { %574 = vmatpush.bf16.msrb.mxu2 %v1200_v15  ;;  %587 = vmatpush.bf16.msrb.mxu3 %v1231_v23 }
 0x367   :  { %575 = vmatpush.bf16.msrb.mxu2 %v1234_v24  ;;  %588 = vmatpush.bf16.msrb.mxu3 %v1251_v29 }
 0x36b   :  { %576 = vmatpush.bf16.msrb.mxu2 %v1254_v30  ;;  %589 = vmatpush.bf16.msrb.mxu3 %v1265_v33 }
 0x3e1   :  { %v377_v1 = vpop.f32.mrf.mxu2  ;;  %v390_v4 = vpop.f32.mrf.mxu3 }
 0x3e2   :  { %v394_v6 = vadd.f32 %v377_v1, %v359_v62  ;;  %v414_v62 = vadd.f32 %v1397_v56, %v390_v4 }
 0x3e4   :  { %v982_v8 = vmul.f32 -1.442695, %v394_v6 }
 0x3e6   :  { %1071 = vpow2.f32 %v982_v8 }
 0x3e9   :  { %v379_v9 = vpop.f32.mrf.mxu2  ;;  %v392_v14 = vpop.f32.mrf.mxu3 }
 0x3ec   :  { %v1072_v16 = vpop.eup %1071 }
 0x3ed   :  { %v398_v18 = vadd.f32 1.0, %v1072_v16 }
 0x3ef   :  { %1073 = vrcp.f32 %v398_v18  ;;  %v410_v54 = vand.u32 2147483648, %v398_v18  ;;  %v408_v22 = vand.u32 2147483647, %v398_v18  ;;  %vm404_vm13 = vweird.f32 %v398_v18 }
 0x3f1   :  { %v411_v34 = vor.u32 1.1754944e-38, %v410_v54  ;;  %vm409_vm15 = vcmp.eq.f32.partialorder %v408_v22, 8.507059e+37 }
 0x3f5   :  { %v1074_v5 = vpop.eup %1073 }
 0x3f6   :  { %v400_v59 = vmul.f32 %v1074_v5, %v398_v18  ;;  %vm405_vm12 = vweird.f32 %v1074_v5 }
 0x3f7   :  { %vm406_vm14 = vmor %vm404_vm13, %vm405_vm12 }
 0x3f8   :  { %v401_v3 = vsub.f32 1.0, %v400_v59 }
 0x3fa   :  { %v402_v21 = vmul.f32 %v1074_v5, %v401_v3 }
 0x3fc   :  { %v403_v32 = vadd.f32 %v1074_v5, %v402_v21 }
 0x3fe   :  { %v407_v35 = vsel %vm406_vm14, %v1074_v5, %v403_v32 }
 0x3ff   :  { %v412_v42 = vsel %vm409_vm15, %v411_v34, %v407_v35 }
 0x400   :  { %v415_v43 = vmul.f32 %v414_v62, %v412_v42  ;;  %v418_v41 = vsub.f32 1.0, %v412_v42  ;;  %v424_v6 = vmul.f32 %v412_v42, %v1444_v46 }
 0x402   :  { %v416_v45 = vadd.f32 %v415_v43, %v360_v37 }
 0x404   :  { %1075 = vtanh.f32 %v416_v45 }
 0x40a   :  { %v1076_v58 = vpop.eup %1075 }
 0x40b   :  { %420 = vrot.lane.b32.xlu2 %v1076_v58, %s1108_s4 }
 0x465   :  { %v421_v1 = vpop.permute.xlu2 %420 }
 0x466   :  { %v423_v8 = vmul.f32 %v421_v1, %v418_v41 }
 0x468   :  { %v1472_v9 = vadd.f32 %v424_v6, %v423_v8 }
 0x46a   :  { %v428_v4 = vpack.c.bf16 %v1472_v9, %v1472_v9 }
 0x46c   :  { %430 = vrot.lane.b32.xlu2 %v428_v4, %s1108_s4 }
 0x4c6   :  { %v431_v14 = vpop.permute.xlu2 %430 }
 0x4c7   :  { %983 = vmatmul.msk.bf16.vlgmr.msra.gmra.mxu2 %vm230_vm7, %v431_v14  ;;  %984 = vmatmul.msk.bf16.vlgmr.msra.gmra.mxu3 %vm230_vm7, %v431_v14 }
 0x4c8   :  { %707 = vmatpush.bf16.msra.mxu2 %v1183_v10  ;;  %720 = vmatpush.bf16.msra.mxu3 %v1218_v20 }
 0x4cc   :  { %708 = vmatpush.bf16.msra.mxu2 %v1200_v15  ;;  %721 = vmatpush.bf16.msra.mxu3 %v1231_v23 }
 0x4d0   :  { %709 = vmatpush.bf16.msra.mxu2 %v1234_v24  ;;  %722 = vmatpush.bf16.msra.mxu3 %v1251_v29 }
 0x4d4   :  { %710 = vmatpush.bf16.msra.mxu2 %v1254_v30  ;;  %723 = vmatpush.bf16.msra.mxu3 %v1265_v33 }
 0x54a   :  { %v444_v37 = vpop.f32.mrf.mxu2  ;;  %v457_v16 = vpop.f32.mrf.mxu3 }
 0x54b   :  { %v461_v10 = vadd.f32 %v444_v37, %v426_v52  ;;  %v481_v52 = vadd.f32 %v1397_v56, %v457_v16 }
 0x54d   :  { %v985_v20 = vmul.f32 -1.442695, %v461_v10 }
 0x54f   :  { %1077 = vpow2.f32 %v985_v20 }
 0x552   :  { %v446_v15 = vpop.f32.mrf.mxu2  ;;  %v459_v23 = vpop.f32.mrf.mxu3 }
 0x555   :  { %v1078_v18 = vpop.eup %1077 }
 0x556   :  { %v465_v24 = vadd.f32 1.0, %v1078_v18 }
 0x558   :  { %1079 = vrcp.f32 %v465_v24  ;;  %v477_v59 = vand.u32 2147483648, %v465_v24  ;;  %v475_v3 = vand.u32 2147483647, %v465_v24  ;;  %vm471_vm3 = vweird.f32 %v465_v24 }
 0x55a   :  { %v478_v21 = vor.u32 1.1754944e-38, %v477_v59  ;;  %vm476_vm5 = vcmp.eq.f32.partialorder %v475_v3, 8.507059e+37 }
 0x55e   :  { %v1080_v29 = vpop.eup %1079 }
 0x55f   :  { %v467_v5 = vmul.f32 %v1080_v29, %v465_v24  ;;  %vm472_vm0 = vweird.f32 %v1080_v29 }
 0x560   :  { %vm473_vm4 = vmor %vm471_vm3, %vm472_vm0 }
 0x561   :  { %v468_v30 = vsub.f32 1.0, %v467_v5 }
 0x563   :  { %v469_v33 = vmul.f32 %v1080_v29, %v468_v30 }
 0x565   :  { %v470_v54 = vadd.f32 %v1080_v29, %v469_v33 }
 0x567   :  { %v474_v22 = vsel %vm473_vm4, %v1080_v29, %v470_v54 }
 0x568   :  { %v479_v32 = vsel %vm476_vm5, %v478_v21, %v474_v22 }
 0x569   :  { %v482_v34 = vmul.f32 %v481_v52, %v479_v32  ;;  %v485_v42 = vsub.f32 1.0, %v479_v32  ;;  %v491_v45 = vmul.f32 %v479_v32, %v1472_v9 }
 0x56b   :  { %v483_v35 = vadd.f32 %v482_v34, %v427_v28 }
 0x56d   :  { %1081 = vtanh.f32 %v483_v35 }
 0x573   :  { %v1082_v62 = vpop.eup %1081 }
 0x574   :  { %487 = vrot.lane.b32.xlu0 %v1082_v62, %s1108_s4 }
 0x5e6   :  { %v488_v43 = vpop.permute.xlu0 %487 }
 0x5e7   :  { %v490_v58 = vmul.f32 %v488_v43, %v485_v42 }
 0x5e9   :  { %v1500_v41 = vadd.f32 %v491_v45, %v490_v58 }
 0x5eb   :  { %v495_v1 = vpack.c.bf16 %v1500_v41, %v1500_v41 }
 0x5ed   :  { %497 = vrot.lane.b32.xlu1 %v495_v1, %s1108_s4 }
 0x65f   :  { %v498_v6 = vpop.permute.xlu1 %497 }
 0x660   :  { %986 = vmatmul.msk.bf16.vlgmr.msrb.gmra.mxu0 %vm230_vm7, %v498_v6  ;;  %987 = vmatmul.msk.bf16.vlgmr.msra.gmra.mxu1 %vm230_vm7, %v498_v6 }
 0x6dd   :  { %v511_v28 = vpop.f32.mrf.mxu0  ;;  %v524_v8 = vpop.f32.mrf.mxu1 }
 0x6de   :  { %v528_v4 = vadd.f32 %v511_v28, %v493_v53  ;;  %v548_v49 = vadd.f32 %v1397_v56, %v524_v8 }
 0x6e0   :  { %v988_v14 = vmul.f32 -1.442695, %v528_v4 }
 0x6e2   :  { %1083 = vpow2.f32 %v988_v14 }
 0x6e5   :  { %v513_v37 = vpop.f32.mrf.mxu0  ;;  %v526_v16 = vpop.f32.mrf.mxu1 }
 0x6e8   :  { %v1084_v10 = vpop.eup %1083 }
 0x6e9   :  { %v532_v20 = vadd.f32 1.0, %v1084_v10 }
 0x6eb   :  { %1085 = vrcp.f32 %v532_v20  ;;  %v544_v24 = vand.u32 2147483648, %v532_v20  ;;  %v542_v5 = vand.u32 2147483647, %v532_v20  ;;  %vm538_vm8 = vweird.f32 %v532_v20 }
 0x6ed   :  { %v545_v59 = vor.u32 1.1754944e-38, %v544_v24  ;;  %vm543_vm10 = vcmp.eq.f32.partialorder %v542_v5, 8.507059e+37 }
 0x6f1   :  { %v1086_v15 = vpop.eup %1085 }
 0x6f2   :  { %v534_v23 = vmul.f32 %v1086_v15, %v532_v20  ;;  %vm539_vm6 = vweird.f32 %v1086_v15 }
 0x6f3   :  { %vm540_vm9 = vmor %vm538_vm8, %vm539_vm6 }
 0x6f4   :  { %v535_v18 = vsub.f32 1.0, %v534_v23 }
 0x6f6   :  { %v536_v29 = vmul.f32 %v1086_v15, %v535_v18 }
 0x6f8   :  { %v537_v30 = vadd.f32 %v1086_v15, %v536_v29 }
 0x6fa   :  { %v541_v44 = vsel %vm540_vm9, %v1086_v15, %v537_v30  ;;  %vm187_vm9 = vcmp.lt.s32.totalorder %v1306_v39, 32 }
 0x6fb   :  { %v546_v53 = vsel %vm543_vm10, %v545_v59, %v541_v44 }
 0x6fc   :  { %v549_v33 = vmul.f32 %v548_v49, %v546_v53  ;;  %v552_v21 = vsub.f32 1.0, %v546_v53  ;;  %v558_v52 = vmul.f32 %v546_v53, %v1500_v41 }
 0x6fe   :  { %v550_v3 = vadd.f32 %v549_v33, %v494_v31 }
 0x700   :  { %1087 = vtanh.f32 %v550_v3 }
 0x706   :  { %v1088_v54 = vpop.eup %1087 }
 0x707   :  { %554 = vrot.lane.b32.xlu2 %v1088_v54, %s1108_s4 }
 0x761   :  { %v555_v22 = vpop.permute.xlu2 %554 }
 0x762   :  { %v557_v32 = vmul.f32 %v555_v22, %v552_v21 }
 0x764   :  { %v1520_v34 = vadd.f32 %v558_v52, %v557_v32 }
 0x766   :  { %v562_v35 = vpack.c.bf16 %v1520_v34, %v1520_v34  ;;  %v1052_v7 = vpack.i.bf16 %v1520_v34, %v1500_v41 }
 0x768   :  { %564 = vrot.lane.b32.xlu0 %v562_v35, %s1108_s4 }
 0x7da   :  { %v565_v62 = vpop.permute.xlu0 %564 }
 0x7db   :  { %989 = vmatmul.msk.bf16.vlgmr.msrb.gmra.mxu2 %vm230_vm7, %v565_v62  ;;  %990 = vmatmul.msk.bf16.vlgmr.msrb.gmra.mxu3 %vm230_vm7, %v565_v62 }
 0x85e   :  { %v578_v19 = vpop.f32.mrf.mxu2  ;;  %v591_v27 = vpop.f32.mrf.mxu3 }
 0x85f   :  { %v595_v31 = vadd.f32 %v578_v19, %v560_v63  ;;  %v615_v57 = vadd.f32 %v1397_v56, %v591_v27 }
 0x861   :  { %v991_v42 = vmul.f32 -1.442695, %v595_v31 }
 0x863   :  { %1089 = vpow2.f32 %v991_v42 }
 0x866   :  { %v580_v43 = vpop.f32.mrf.mxu2  ;;  %v593_v45 = vpop.f32.mrf.mxu3 }
 0x869   :  { %v1090_v58 = vpop.eup %1089 }
 0x86a   :  { %v599_v1 = vadd.f32 1.0, %v1090_v58 }
 0x86c   :  { %1091 = vrcp.f32 %v599_v1  ;;  %v611_v4 = vand.u32 2147483648, %v599_v1  ;;  %v609_v37 = vand.u32 2147483647, %v599_v1  ;;  %vm605_vm12 = vweird.f32 %v599_v1 }
 0x86e   :  { %v612_v10 = vor.u32 1.1754944e-38, %v611_v4  ;;  %vm610_vm14 = vcmp.eq.f32.partialorder %v609_v37, 8.507059e+37  ;;  %v1042_v4 = vpack.i.bf16 %v1444_v46, %v1421_v26 }
 0x872   :  { %v1092_v6 = vpop.eup %1091 }
 0x873   :  { %v601_v28 = vmul.f32 %v1092_v6, %v599_v1  ;;  %vm606_vm11 = vweird.f32 %v1092_v6 }
 0x874   :  { %vm607_vm13 = vmor %vm605_vm12, %vm606_vm11 }
 0x875   :  { %v602_v8 = vsub.f32 1.0, %v601_v28 }
 0x877   :  { %v603_v14 = vmul.f32 %v1092_v6, %v602_v8 }
 0x879   :  { %v604_v16 = vadd.f32 %v1092_v6, %v603_v14 }
 0x87b   :  { %v608_v40 = vsel %vm607_vm13, %v1092_v6, %v604_v16 }
 0x87c   :  { %v613_v63 = vsel %vm610_vm14, %v612_v10, %v608_v40 }
 0x87d   :  { %v616_v20 = vmul.f32 %v615_v57, %v613_v63  ;;  %v619_v18 = vsub.f32 1.0, %v613_v63  ;;  %v625_v29 = vmul.f32 %v613_v63, %v1520_v34 }
 0x87f   :  { %v617_v15 = vadd.f32 %v616_v20, %v561_v38 }
 0x881   :  { %1093 = vtanh.f32 %v617_v15 }
 0x887   :  { %v1094_v23 = vpop.eup %1093 }
 0x888   :  { %621 = vrot.lane.b32.xlu1 %v1094_v23, %s1108_s4 }
 0x8fa   :  { %v622_v24 = vpop.permute.xlu1 %621 }
 0x8fb   :  { %v624_v5 = vmul.f32 %v622_v24, %v619_v18 }
 0x8fd   :  { %v1540_v30 = vadd.f32 %v625_v29, %v624_v5 }
 0x8ff   :  { %v629_v59 = vpack.c.bf16 %v1540_v30, %v1540_v30  ;;  %v1047_v25 = vpack.i.bf16 %v1540_v30, %v1472_v9 }
 0x901   :  { %631 = vrot.lane.b32.xlu2 %v629_v59, %s1108_s4 }
 0x95b   :  { %v632_v44 = vpop.permute.xlu2 %631 }
 0x95c   :  { %992 = vmatmul.msk.bf16.vlgmr.msra.gmra.mxu0 %vm230_vm7, %v632_v44  ;;  %993 = vmatmul.msk.bf16.vlgmr.msrb.gmra.mxu1 %vm230_vm7, %v632_v44 }
 0x9d9   :  { %v645_v13 = vpop.f32.mrf.mxu0  ;;  %v658_v36 = vpop.f32.mrf.mxu1 }
 0x9da   :  { %v662_v38 = vadd.f32 %v645_v13, %v627_v55  ;;  %v682_v51 = vadd.f32 %v1397_v56, %v658_v36 }
 0x9dc   :  { %v994_v49 = vmul.f32 -1.442695, %v662_v38 }
 0x9de   :  { %1095 = vpow2.f32 %v994_v49 }
 0x9e1   :  { %v647_v53 = vpop.f32.mrf.mxu0  ;;  %v660_v33 = vpop.f32.mrf.mxu1 }
 0x9e4   :  { %v1096_v3 = vpop.eup %1095 }
 0x9e5   :  { %v666_v54 = vadd.f32 1.0, %v1096_v3 }
 0x9e7   :  { %1097 = vrcp.f32 %v666_v54  ;;  %v678_v32 = vand.u32 2147483648, %v666_v54  ;;  %v676_v62 = vand.u32 2147483647, %v666_v54  ;;  %vm672_vm0 = vweird.f32 %v666_v54 }
 0x9e9   :  { %v679_v27 = vor.u32 1.1754944e-38, %v678_v32  ;;  %vm677_vm4 = vcmp.eq.f32.partialorder %v676_v62, 8.507059e+37 }
 0x9ed   :  { %v1098_v21 = vpop.eup %1097 }
 0x9ee   :  { %v668_v22 = vmul.f32 %v1098_v21, %v666_v54  ;;  %vm673_vm15 = vweird.f32 %v1098_v21 }
 0x9ef   :  { %vm674_vm3 = vmor %vm672_vm0, %vm673_vm15 }
 0x9f0   :  { %v669_v52 = vsub.f32 1.0, %v668_v22 }
 0x9f2   :  { %v670_v35 = vmul.f32 %v1098_v21, %v669_v52 }
 0x9f4   :  { %v671_v19 = vadd.f32 %v1098_v21, %v670_v35 }
 0x9f6   :  { %v675_v47 = vsel %vm674_vm3, %v1098_v21, %v671_v19 }
 0x9f7   :  { %v680_v55 = vsel %vm677_vm4, %v679_v27, %v675_v47 }
 0x9f8   :  { %v683_v31 = vmul.f32 %v682_v51, %v680_v55  ;;  %v686_v45 = vsub.f32 1.0, %v680_v55  ;;  %v692_v1 = vmul.f32 %v680_v55, %v1540_v30 }
 0x9fa   :  { %v684_v42 = vadd.f32 %v683_v31, %v628_v2 }
 0x9fc   :  { %1099 = vtanh.f32 %v684_v42 }
 0xa02   :  { %v1100_v43 = vpop.eup %1099 }
 0xa03   :  { %688 = vrot.lane.b32.xlu0 %v1100_v43, %s1108_s4 }
 0xa75   :  { %v689_v58 = vpop.permute.xlu0 %688 }
 0xa76   :  { %v691_v6 = vmul.f32 %v689_v58, %v686_v45 }
 0xa78   :  { %v693_v28 = vadd.f32 %v692_v1, %v691_v6  ;;  %v1058_v1 = vld [vmem:[%s1667_s6] ss:$0 sm:$0xff] }
 0xa7a   :  { %v696_v8 = vpack.c.bf16 %v693_v28, %v693_v28 }
 0xa7c   :  { %698 = vrot.lane.b32.xlu1 %v696_v8, %s1108_s4 }
 0xa84   :  { %1043 = vrot.lane.b32.xlu1 %v1042_v4, %s1108_s4 }
 0xa8c   :  { %1053 = vrot.lane.b32.xlu1 %v1052_v7, %s1108_s4 }
 0xaee   :  { %v699_v50 = vpop.permute.xlu1 %698 }
 0xaef   :  { %995 = vmatmul.msk.bf16.vlgmr.msra.gmra.mxu2 %vm230_vm7, %v699_v50  ;;  %996 = vmatmul.msk.bf16.vlgmr.msra.gmra.mxu3 %vm230_vm7, %v699_v50 }
 0xaf6   :  { %v1044_v38 = vpop.permute.xlu1 %1043 }
 0xaf7   :  { %v1046_v49 = vunpack.i.h.bf16 %v1044_v38  ;;  %v1045_v53 = vunpack.i.l.bf16 %v1044_v38 }
 0xafe   :  { %v1054_v52 = vpop.permute.xlu1 %1053 }
 0xaff   :  { %v1056_v62 = vunpack.i.h.bf16 %v1054_v52  ;;  %v1055_v19 = vunpack.i.l.bf16 %v1054_v52 }
 0xb01   :  { %v802_v47 = vsel %vm187_vm9, %v1055_v19, %v1056_v62  ;;  %v803_v31 = vsel %vm187_vm9, %v1056_v62, %v1055_v19 }
 0xb72   :  { %v712_v2 = vpop.f32.mrf.mxu2  ;;  %v725_v14 = vpop.f32.mrf.mxu3 }
 0xb73   :  { %v729_v26 = vadd.f32 %v712_v2, %v694_v0  ;;  %v749_v61 = vadd.f32 %v1397_v56, %v725_v14  ;;  %v1035_v56 = vld [vmem:[%s1668_s5 + $0x18] sm:$0xff] }
 0xb74   :  { %863 = vmatpush.bf16.msrb.mxu0 %v1035_v56 }
 0xb75   :  { %v997_v46 = vmul.f32 -1.442695, %v729_v26 }
 0xb77   :  { %1101 = vpow2.f32 %v997_v46 }
 0xb78   :  { %864 = vmatpush.bf16.msrb.mxu0 %v1034_v11 }
 0xb7a   :  { %v714_v37 = vpop.f32.mrf.mxu2  ;;  %v727_v16 = vpop.f32.mrf.mxu3 }
 0xb7c   :  { %865 = vmatpush.bf16.msrb.mxu0 %v1033_v12 }
 0xb7d   :  { %v1102_v41 = vpop.eup %1101 }
 0xb7e   :  { %v733_v34 = vadd.f32 1.0, %v1102_v41 }
 0xb80   :  { %1103 = vrcp.f32 %v733_v34  ;;  %v745_v63 = vand.u32 2147483648, %v733_v34  ;;  %v743_v15 = vand.u32 2147483647, %v733_v34  ;;  %vm739_vm6 = vweird.f32 %v733_v34 }
 0xb82   :  { %v746_v48 = vor.u32 1.1754944e-38, %v745_v63  ;;  %vm744_vm1 = vcmp.eq.f32.partialorder %v743_v15, 8.507059e+37 }
 0xb86   :  { %v1104_v10 = vpop.eup %1103 }
 0xb87   :  { %v735_v40 = vmul.f32 %v1104_v10, %v733_v34  ;;  %vm740_vm5 = vweird.f32 %v1104_v10 }
 0xb88   :  { %vm741_vm8 = vmor %vm739_vm6, %vm740_vm5 }
 0xb89   :  { %v736_v57 = vsub.f32 1.0, %v735_v40 }
 0xb8b   :  { %v737_v20 = vmul.f32 %v1104_v10, %v736_v57 }
 0xb8d   :  { %v738_v23 = vadd.f32 %v1104_v10, %v737_v20 }
 0xb8f   :  { %v742_v60 = vsel %vm741_vm8, %v1104_v10, %v738_v23 }
 0xb90   :  { %v747_v0 = vsel %vm744_vm1, %v746_v48, %v742_v60 }
 0xb91   :  { %v750_v18 = vmul.f32 %v749_v61, %v747_v0  ;;  %v753_v5 = vsub.f32 1.0, %v747_v0  ;;  %v759_v44 = vmul.f32 %v747_v0, %v693_v28 }
 0xb93   :  { %v751_v24 = vadd.f32 %v750_v18, %v695_v17  ;;  %v1032_v17 = vld [vmem:[%s1668_s5] sm:$0xff] }
 0xb94   :  { %866 = vmatpush.bf16.msrb.mxu0 %v1032_v17 }
 0xb95   :  { %1105 = vtanh.f32 %v751_v24 }
 0xb9b   :  { %v1106_v29 = vpop.eup %1105 }
 0xb9c   :  { %755 = vrot.lane.b32.xlu2 %v1106_v29, %s1108_s4 }
 0xba4   :  { %781 = vrot.lane.b32.xlu2 %v693_v28, %s1108_s4 }
 0xbf6   :  { %v756_v59 = vpop.permute.xlu2 %755 }
 0xbf7   :  { %v758_v13 = vmul.f32 %v756_v59, %v753_v5 }
 0xbf9   :  { %v760_v36 = vadd.f32 %v759_v44, %v758_v13 }
 0xbfb   :  { %767 = vrot.lane.b32.xlu2 %v760_v36, %s1109_s30  ;;  %762 = vrot.lane.b32.xlu0 %v760_v36, %s1108_s4 }
 0xbfe   :  { %v782_v9 = vpop.permute.xlu2 %781 }
 0xbff   :  { %v784_v3 = vsel %vm187_vm9, %v1046_v49, %v782_v9  ;;  %v805_v45 = vsel %vm187_vm9, %v782_v9, %v1046_v49 }
 0xc03   :  { %1048 = vrot.lane.b32.xlu0 %v1047_v25, %s1108_s4 }
 0xc55   :  { %v768_v30 = vpop.permute.xlu2 %767 }
 0xc56   :  { %770 = vst.msk [vmem:[%s1669_s8 + $0x8] sm:$0xff] %vm765_vm2, %v768_v30 }
 0xc6d   :  { %v763_v33 = vpop.permute.xlu0 %762 }
 0xc6e   :  { %766 = vst.msk [vmem:[%s1669_s8] sm:$0xff] %vm765_vm2, %v763_v33  ;;  %v775_v54 = vsel %vm187_vm9, %v1045_v53, %v763_v33  ;;  %v806_v43 = vsel %vm187_vm9, %v763_v33, %v1045_v53 }
 0xc6f   :  { %v807_v21 = vpack.c.bf16 %v784_v3, %v775_v54  ;;  %v810_v58 = vpack.c.bf16 %v806_v43, %v805_v45 }
 0xc71   :  { %1014 = vmatmul.msk.bf16.vlgmr.msrb.gmra.mxu0 %vm230_vm7, %v807_v21 }
 0xc75   :  { %v1049_v22 = vpop.permute.xlu0 %1048 }
 0xc76   :  { %v1051_v32 = vunpack.i.h.bf16 %v1049_v22  ;;  %v1050_v35 = vunpack.i.l.bf16 %v1049_v22 }
 0xc78   :  { %v793_v27 = vsel %vm187_vm9, %v1050_v35, %v1051_v32  ;;  %v804_v55 = vsel %vm187_vm9, %v1051_v32, %v1050_v35 }
 0xc79   :  { %v808_v51 = vpack.c.bf16 %v802_v47, %v793_v27  ;;  %v809_v42 = vpack.c.bf16 %v804_v55, %v803_v31 }
 0xc81   :  { %1015 = vmatmul.msk.bf16.gmra.mxu0 %vm230_vm7, %v808_v51 }
 0xc91   :  { %1016 = vmatmul.msk.bf16.gmra.mxu0 %vm230_vm7, %v809_v42 }
 0xca1   :  { %1017 = vmatmul.msk.bf16.gmra.mxu0 %vm230_vm7, %v810_v58 }
 0xcee   :  { %v868_v6 = vpop.f32.mrf.mxu0 }
 0xcef   :  { %v869_v28 = vadd.f32 %v1058_v1, %v868_v6 }
 0xcf1   :  { %v888_v8 = vmax.f32 %v869_v28, 0.0 }
 0xcf3   :  { %896 = vst.msk [vmem:[%s1670_s7] sm:$0xff] %vm765_vm2, %v888_v8 }
 0xcf6   :  { %v870_v4 = vpop.f32.mrf.mxu0 }
 0xcf7   :  { %v871_v7 = vadd.f32 %v1058_v1, %v870_v4 }
 0xcf9   :  { %v889_v50 = vmax.f32 %v871_v7, 0.0 }
 0xcfb   :  { %897 = vst.msk [vmem:[%s1670_s7 + $0x8] sm:$0xff] %vm765_vm2, %v889_v50 }
 0xcfe   :  { %v873_v39 = vpop.f32.mrf.mxu0 }
 0xcff   :  { %v874_v2 = vadd.f32 %v1058_v1, %v873_v39 }
 0xd01   :  { %v890_v14 = vmax.f32 %v874_v2, 0.0 }
 0xd03   :  { %898 = vst.msk [vmem:[%s1670_s7 + $0x10] sm:$0xff] %vm765_vm2, %v890_v14 }
 0xd06   :  { %v875_v26 = vpop.f32.mrf.mxu0 }
 0xd07   :  { %v876_v46 = vadd.f32 %v1058_v1, %v875_v26 }
 0xd09   :  { %v891_v37 = vmax.f32 %v876_v46, 0.0 }
 0xd0b   :  { %899 = vst.msk [vmem:[%s1670_s7 + $0x18] sm:$0xff] %vm765_vm2, %v891_v37 }
 0xd0e   :  { %v878_v16 = vpop.f32.mrf.mxu0 }
 0xd0f   :  { %v879_v41 = vadd.f32 %v1058_v1, %v878_v16 }
 0xd11   :  { %v892_v34 = vmax.f32 %v879_v41, 0.0 }
 0xd13   :  { %900 = vst.msk [vmem:[%s1670_s7 + $0x20] sm:$0xff] %vm765_vm2, %v892_v34 }
 0xd16   :  { %v880_v10 = vpop.f32.mrf.mxu0 }
 0xd17   :  { %v881_v40 = vadd.f32 %v1058_v1, %v880_v10 }
 0xd19   :  { %v893_v57 = vmax.f32 %v881_v40, 0.0 }
 0xd1b   :  { %901 = vst.msk [vmem:[%s1670_s7 + $0x28] sm:$0xff] %vm765_vm2, %v893_v57 }
 0xd1e   :  { %v883_v63 = vpop.f32.mrf.mxu0 }
 0xd1f   :  { %v884_v20 = vadd.f32 %v1058_v1, %v883_v63 }
 0xd21   :  { %v894_v15 = vmax.f32 %v884_v20, 0.0 }
 0xd23   :  { %902 = vst.msk [vmem:[%s1670_s7 + $0x30] sm:$0xff] %vm765_vm2, %v894_v15 }
 0xd26   :  { %v885_v23 = vpop.f32.mrf.mxu0 }
 0xd27   :  { %v886_v48 = vadd.f32 %v1058_v1, %v885_v23 }
 0xd29   :  { %v895_v60 = vmax.f32 %v886_v48, 0.0 }
 0xd2b   :  { %903 = vst.msk [vmem:[%s1670_s7 + $0x38] sm:$0xff] %vm765_vm2, %v895_v60 }

</bundles_post_ra>
